<compile_context>
chip_gen: v7x
topology: tpu7x:2x2x1
jax: 0.10.0
libtpu: 0.0.40
codegen_flags: <defaults>
</compile_context>

<pallas_src>
import numpy as np
import jax
import jax.numpy as jnp
from jax.experimental import pallas as pl
from jax.experimental.pallas import tpu as pltpu

N_BLOCKS = 3        # n_blocks (MADE blocks in the MAF)
INPUT_SIZE = 16     # input_size (D)
HIDDEN = 32         # hidden_size (H)
N_HIDDEN = 1        # n_hidden (kernel is specialized to 1 hidden->hidden layer)
N_COMPONENTS = 2    # n_components (C) of the MADEMOG head
BATCH = 8


# --------------------------------------------------------------------------- #
# MADE autoregressive masks (create_masks, 'sequential' order)                 #
# --------------------------------------------------------------------------- #
def create_masks_np(input_size, hidden_size, n_hidden, input_degrees=None):
    d_in = np.arange(input_size) if input_degrees is None else np.asarray(input_degrees)
    degrees = [d_in]
    for _ in range(n_hidden + 1):
        degrees.append(np.arange(hidden_size) % (input_size - 1))
    degrees.append((d_in % input_size) - 1)
    masks = [(d1[:, None] >= d0[None, :]).astype(np.float32)
             for d0, d1 in zip(degrees[:-1], degrees[1:])]
    return masks, d_in            # masks[l] has shape (out_features, in_features)


# --------------------------------------------------------------------------- #
# Pallas kernel                                                                #
# --------------------------------------------------------------------------- #
def mafmog_kernel(x_ref,
                  maf_w01_ref, maf_b01_ref, maf_w2_ref, maf_b2_ref,
                  mog_w01_ref, mog_b01_ref, mog_w2_ref, mog_b2_ref,
                  out_ref):
    D, H, C = INPUT_SIZE, HIDDEN, N_COMPONENTS
    CD = C * D

    x = x_ref[...]                              # (TB, D)
    maf_ldj = jnp.zeros_like(x)                 # running MAF log|det|

    # ---- MAF: N_BLOCKS MADE blocks (static unroll; tiny live set, no spill) ----
    for i in range(N_BLOCKS):
        w01 = maf_w01_ref[i]                    # (D+H, H): rows [0:D]=W0, [D:D+H]=W1
        b01 = maf_b01_ref[i]                    # (2, H)
        w2 = maf_w2_ref[i]                      # (H, 2D)
        b2 = maf_b2_ref[i]                      # (1, 2D)

        h = jnp.dot(x, w01[0:D, :], preferred_element_type=jnp.float32) + b01[0:1, :]
        h = jnp.dot(jnp.maximum(h, 0.0), w01[D:D + H, :],
                    preferred_element_type=jnp.float32) + b01[1:2, :]
        out = jnp.dot(jnp.maximum(h, 0.0), w2,
                      preferred_element_type=jnp.float32) + b2          # (TB, 2D)

        m = out[:, 0:D]
        loga = out[:, D:2 * D]
        x = (x - m) * jnp.exp(-loga)            # MADE forward transform
        maf_ldj = maf_ldj - loga

    # ---- MADEMOG head: one masked MLP -> (m, loga, logr) per mixture component ----
    w01 = mog_w01_ref[...]                      # (D+H, H)
    b01 = mog_b01_ref[...]                      # (2, H)
    h = jnp.dot(x, w01[0:D, :], preferred_element_type=jnp.float32) + b01[0:1, :]
    h = jnp.dot(jnp.maximum(h, 0.0), w01[D:D + H, :],
                preferred_element_type=jnp.float32) + b01[1:2, :]
    out = jnp.dot(jnp.maximum(h, 0.0), mog_w2_ref[...],
                  preferred_element_type=jnp.float32) + mog_b2_ref[...]  # (TB, 3*C*D)

    # columns were permuted host-side to [m(CD) | loga(CD) | logr(CD)], c-major
    m = out[:, 0:CD]
    loga = out[:, CD:2 * CD]
    logr = out[:, 2 * CD:3 * CD]

    x_rep = jnp.concatenate([x] * C, axis=1)          # x.repeat(1, C)  (c-major)
    ldj_rep = jnp.concatenate([maf_ldj] * C, axis=1)  # maf_ldj.unsqueeze(1) broadcast

    u = (x_rep - m) * jnp.exp(-loga)
    sum_ldj = ldj_rep - loga                          # maf_ldj + (-loga)

    # normalized mixture logits: logr - logsumexp over components
    comps = [logr[:, c * D:(c + 1) * D] for c in range(C)]
    mx = comps[0]
    for c in range(1, C):
        mx = jnp.maximum(mx, comps[c])
    ssum = jnp.zeros_like(mx)
    for c in range(C):
        ssum = ssum + jnp.exp(comps[c] - mx)
    lse = mx + jnp.log(ssum)
    logr_norm = jnp.concatenate([comps[c] - lse for c in range(C)], axis=1)

    # single lane-dense store: [u | sum_ldj | logr_norm]  -> (TB, 3*C*D)
    out_ref[...] = jnp.concatenate([u, sum_ldj, logr_norm], axis=1)


# --------------------------------------------------------------------------- #
# Wrapper                                                                      #
# --------------------------------------------------------------------------- #
def mafmog_forward(x, packed):
    """Returns (u, sum_log_abs_det_jacobians, logr) — u/ldj as in MAFMOG.forward,
    logr is the normalized mixture logits stored as self.mademog.logr."""
    B, D = x.shape
    C = N_COMPONENTS
    OUT_W = 3 * C * D
    (maf_w01, maf_b01, maf_w2, maf_b2, mog_w01, mog_b01, mog_w2, mog_b2) = packed

    # Tile the batch; weights stay resident (constant index_map).  At B=8 this is
    # a single grid step; for large B the "parallel" axis shards across TCs (v7x).
    TILE_B = B if B <= 256 else 256
    assert B % TILE_B == 0
    grid = (B // TILE_B,)

    def full(arr):
        nd = arr.ndim
        return pl.BlockSpec(arr.shape, lambda b, _nd=nd: (0,) * _nd)

    out = pl.pallas_call(
        mafmog_kernel,
        out_shape=jax.ShapeDtypeStruct((B, OUT_W), jnp.float32),
        grid=grid,
        in_specs=[
            pl.BlockSpec((TILE_B, D), lambda b: (b, 0)),
            full(maf_w01), full(maf_b01), full(maf_w2), full(maf_b2),
            full(mog_w01), full(mog_b01), full(mog_w2), full(mog_b2),
        ],
        out_specs=pl.BlockSpec((TILE_B, OUT_W), lambda b: (b, 0)),
        compiler_params=pltpu.CompilerParams(dimension_semantics=("parallel",)),
    )(x, maf_w01, maf_b01, maf_w2, maf_b2, mog_w01, mog_b01, mog_w2, mog_b2)

    CD = C * D
    u = out[:, 0:CD].reshape(B, C, D)
    sum_ldj = out[:, CD:2 * CD].reshape(B, C, D)
    logr = out[:, 2 * CD:3 * CD].reshape(B, C, D)
    return u, sum_ldj, logr


# --------------------------------------------------------------------------- #
# Parameters (PyTorch layout) + host-side packing                              #
# --------------------------------------------------------------------------- #
def init_params(key):
    """Synthetic params in PyTorch layout: weights (out_features, in_features),
    autoregressive masks pre-applied (MaskedLinear == Linear with masked weight)."""
    assert N_HIDDEN == 1, "kernel is specialized to n_hidden=1"
    D, H, C = INPUT_SIZE, HIDDEN, N_COMPONENTS
    keys = iter(jax.random.split(key, 6 * (N_BLOCKS + 1)))
    w = lambda shape: 0.1 * jax.random.normal(next(keys), shape, jnp.float32)

    maf_blocks = []
    input_degrees = None
    for _ in range(N_BLOCKS):
        masks, deg_in = create_masks_np(D, H, N_HIDDEN, input_degrees)
        input_degrees = deg_in[::-1].copy()        # .flip(0) chained to next block
        maf_blocks.append({
            "W0": w((H, D)) * jnp.asarray(masks[0]),
            "b0": w((H,)),
            "W1": w((H, H)) * jnp.asarray(masks[1]),
            "b1": w((H,)),
            "W2": w((2 * D, H)) * jnp.asarray(np.tile(masks[2], (2, 1))),
            "b2": w((2 * D,)),
        })

    # MADEMOG uses the flipped input_degrees of the last MAF block
    masks, _ = create_masks_np(D, H, N_HIDDEN, input_degrees)
    mog = {
        "W0": w((H, D)) * jnp.asarray(masks[0]),
        "b0": w((H,)),
        "W1": w((H, H)) * jnp.asarray(masks[1]),
        "b1": w((H,)),
        "W2": w((3 * C * D, H)) * jnp.asarray(np.tile(masks[2], (3 * C, 1))),
        "b2": w((3 * C * D,)),
    }
    return {"maf_blocks": maf_blocks, "mog": mog}


def pack_params(tparams):
    """Repack torch-layout params into the kernel layout (transposed, concatenated,
    stacked across blocks, MADEMOG output features permuted (c,k,d) -> (k,c,d))."""
    D, H, C = INPUT_SIZE, HIDDEN, N_COMPONENTS
    blks = tparams["maf_blocks"]
    maf_w01 = jnp.stack([jnp.concatenate([b["W0"].T, b["W1"].T], axis=0) for b in blks])
    maf_b01 = jnp.stack([jnp.stack([b["b0"], b["b1"]]) for b in blks])
    maf_w2 = jnp.stack([b["W2"].T for b in blks])
    maf_b2 = jnp.stack([b["b2"][None, :] for b in blks])

    mog = tparams["mog"]
    mog_w01 = jnp.concatenate([mog["W0"].T, mog["W1"].T], axis=0)
    mog_b01 = jnp.stack([mog["b0"], mog["b1"]])
    perm = np.array([c * 3 * D + k * D + d
                     for k in range(3) for c in range(C) for d in range(D)],
                    dtype=np.int32)
    mog_w2 = mog["W2"].T[:, perm]
    mog_b2 = mog["b2"][perm][None, :]
    return (maf_w01, maf_b01, maf_w2, maf_b2, mog_w01, mog_b01, mog_w2, mog_b2)


# --------------------------------------------------------------------------- #
# Pure-JAX reference (literal translation of the PyTorch forward passes)       #
# --------------------------------------------------------------------------- #
def reference_forward(x, tparams):
    D, C = INPUT_SIZE, N_COMPONENTS
    N = x.shape[0]
    maf_ldj = jnp.zeros_like(x)
    for blk in tparams["maf_blocks"]:                       # MADE.forward per block
        h = x @ blk["W0"].T + blk["b0"]
        h = jax.nn.relu(h) @ blk["W1"].T + blk["b1"]
        out = jax.nn.relu(h) @ blk["W2"].T + blk["b2"]
        m, loga = out[:, :D], out[:, D:]
        x = (x - m) * jnp.exp(-loga)
        maf_ldj = maf_ldj + (-loga)

    mog = tparams["mog"]                                    # MADEMOG.forward
    h = x @ mog["W0"].T + mog["b0"]
    h = jax.nn.relu(h) @ mog["W1"].T + mog["b1"]
    out = (jax.nn.relu(h) @ mog["W2"].T + mog["b2"]).reshape(N, C, 3 * D)
    m, loga, logr = out[:, :, :D], out[:, :, D:2 * D], out[:, :, 2 * D:]
    x_rep = jnp.broadcast_to(x[:, None, :], (N, C, D))
    u = (x_rep - m) * jnp.exp(-loga)
    sum_ldj = maf_ldj[:, None, :] + (-loga)                 # MAFMOG.forward combine
    logr_norm = logr - jax.nn.logsumexp(logr, axis=1, keepdims=True)
    return u, sum_ldj, logr_norm


if __name__ == "__main__":
    key = jax.random.PRNGKey(0)
    kx, kp = jax.random.split(key)
    x = jax.random.normal(kx, (BATCH, INPUT_SIZE), jnp.float32)
    tparams = init_params(kp)
    packed = pack_params(tparams)

    u, sum_ldj, logr = mafmog_forward(x, packed)
    u, sum_ldj, logr = jax.block_until_ready((u, sum_ldj, logr))

    u_ref, ldj_ref, logr_ref = reference_forward(x, tparams)
    assert u.shape == (BATCH, N_COMPONENTS, INPUT_SIZE)
    assert sum_ldj.shape == (BATCH, N_COMPONENTS, INPUT_SIZE)
    assert jnp.allclose(u, u_ref, atol=1e-4, rtol=1e-4)
    assert jnp.allclose(sum_ldj, ldj_ref, atol=1e-4, rtol=1e-4)
    assert jnp.allclose(logr, logr_ref, atol=1e-4, rtol=1e-4)
    print("KERNEL_OK")
</pallas_src>

<mosaic_0001>
module attributes {stable_mosaic.version = 11 : i64} {
  func.func @mafmog_kernel(%arg0: i32, %arg1: memref<8x16xf32, #tpu.memory_space<vmem>>, %arg2: memref<3x48x32xf32, #tpu.memory_space<vmem>>, %arg3: memref<3x2x32xf32, #tpu.memory_space<vmem>>, %arg4: memref<3x32x32xf32, #tpu.memory_space<vmem>>, %arg5: memref<3x1x32xf32, #tpu.memory_space<vmem>>, %arg6: memref<48x32xf32, #tpu.memory_space<vmem>>, %arg7: memref<2x32xf32, #tpu.memory_space<vmem>>, %arg8: memref<32x96xf32, #tpu.memory_space<vmem>>, %arg9: memref<1x96xf32, #tpu.memory_space<vmem>>, %arg10: memref<8x96xf32, #tpu.memory_space<vmem>>) attributes {dimension_semantics = [#tpu.dimension_semantics<parallel>], iteration_bounds = array<i64: 1>, scalar_prefetch = 0 : i64, scratch_operands = 0 : i64, tpu.core_type = #tpu.core_type<tc>, window_params = [{transform_indices = @transform_0, window_bounds = array<i64: 8, 16>}, {pipeline_mode = #tpu.pipeline_mode<synchronous>, transform_indices = @transform_1, window_bounds = array<i64: 3, 48, 32>}, {pipeline_mode = #tpu.pipeline_mode<synchronous>, transform_indices = @transform_2, window_bounds = array<i64: 3, 2, 32>}, {pipeline_mode = #tpu.pipeline_mode<synchronous>, transform_indices = @transform_3, window_bounds = array<i64: 3, 32, 32>}, {pipeline_mode = #tpu.pipeline_mode<synchronous>, transform_indices = @transform_4, window_bounds = array<i64: 3, 1, 32>}, {pipeline_mode = #tpu.pipeline_mode<synchronous>, transform_indices = @transform_5, window_bounds = array<i64: 48, 32>}, {pipeline_mode = #tpu.pipeline_mode<synchronous>, transform_indices = @transform_6, window_bounds = array<i64: 2, 32>}, {pipeline_mode = #tpu.pipeline_mode<synchronous>, transform_indices = @transform_7, window_bounds = array<i64: 32, 96>}, {pipeline_mode = #tpu.pipeline_mode<synchronous>, transform_indices = @transform_8, window_bounds = array<i64: 1, 96>}, {transform_indices = @transform_9, window_bounds = array<i64: 8, 96>}]} {
    %c0 = arith.constant 0 : index
    %c0_0 = arith.constant 0 : index
    %0 = vector.load %arg1[%c0, %c0_0] : memref<8x16xf32, #tpu.memory_space<vmem>>, vector<8x16xf32>
    %cst = arith.constant 0.000000e+00 : f32
    %1 = vector.broadcast %cst : f32 to vector<8x16xf32>
    %c0_1 = arith.constant 0 : index
    %c0_2 = arith.constant 0 : index
    %c0_3 = arith.constant 0 : index
    %2 = vector.load %arg2[%c0_1, %c0_2, %c0_3] : memref<3x48x32xf32, #tpu.memory_space<vmem>>, vector<1x48x32xf32>
    %3 = vector.shape_cast %2 : vector<1x48x32xf32> to vector<48x32xf32>
    %c0_4 = arith.constant 0 : index
    %c0_5 = arith.constant 0 : index
    %c0_6 = arith.constant 0 : index
    %4 = vector.load %arg3[%c0_4, %c0_5, %c0_6] : memref<3x2x32xf32, #tpu.memory_space<vmem>>, vector<1x2x32xf32>
    %5 = vector.shape_cast %4 : vector<1x2x32xf32> to vector<2x32xf32>
    %c0_7 = arith.constant 0 : index
    %c0_8 = arith.constant 0 : index
    %c0_9 = arith.constant 0 : index
    %6 = vector.load %arg4[%c0_7, %c0_8, %c0_9] : memref<3x32x32xf32, #tpu.memory_space<vmem>>, vector<1x32x32xf32>
    %7 = vector.shape_cast %6 : vector<1x32x32xf32> to vector<32x32xf32>
    %c0_10 = arith.constant 0 : index
    %c0_11 = arith.constant 0 : index
    %c0_12 = arith.constant 0 : index
    %8 = vector.load %arg5[%c0_10, %c0_11, %c0_12] : memref<3x1x32xf32, #tpu.memory_space<vmem>>, vector<1x1x32xf32>
    %9 = vector.shape_cast %8 : vector<1x1x32xf32> to vector<1x32xf32>
    %10 = vector.extract_strided_slice %3 {offsets = [0, 0], sizes = [16, 32], strides = [1, 1]} : vector<48x32xf32> to vector<16x32xf32>
    %cst_13 = arith.constant dense<0.000000e+00> : vector<8x32xf32>
    %11 = tpu.matmul %0, %10, %cst_13 {dimension_numbers = #tpu.dot_dimension_numbers<[1], [0], [0], [1], [0, 0, 1, 1], [], []>} : vector<8x16xf32>, vector<16x32xf32>, vector<8x32xf32> -> vector<8x32xf32>
    %12 = vector.extract_strided_slice %5 {offsets = [0, 0], sizes = [1, 32], strides = [1, 1]} : vector<2x32xf32> to vector<1x32xf32>
    %13 = vector.broadcast %12 : vector<1x32xf32> to vector<8x32xf32>
    %14 = arith.addf %11, %13 : vector<8x32xf32>
    %cst_14 = arith.constant 0.000000e+00 : f32
    %15 = vector.broadcast %cst_14 : f32 to vector<8x32xf32>
    %16 = arith.maximumf %14, %15 : vector<8x32xf32>
    %17 = vector.extract_strided_slice %3 {offsets = [16, 0], sizes = [32, 32], strides = [1, 1]} : vector<48x32xf32> to vector<32x32xf32>
    %cst_15 = arith.constant dense<0.000000e+00> : vector<8x32xf32>
    %18 = tpu.matmul %16, %17, %cst_15 {dimension_numbers = #tpu.dot_dimension_numbers<[1], [0], [0], [1], [0, 0, 1, 1], [], []>} : vector<8x32xf32>, vector<32x32xf32>, vector<8x32xf32> -> vector<8x32xf32>
    %19 = vector.extract_strided_slice %5 {offsets = [1, 0], sizes = [1, 32], strides = [1, 1]} : vector<2x32xf32> to vector<1x32xf32>
    %20 = vector.broadcast %19 : vector<1x32xf32> to vector<8x32xf32>
    %21 = arith.addf %18, %20 : vector<8x32xf32>
    %cst_16 = arith.constant 0.000000e+00 : f32
    %22 = vector.broadcast %cst_16 : f32 to vector<8x32xf32>
    %23 = arith.maximumf %21, %22 : vector<8x32xf32>
    %cst_17 = arith.constant dense<0.000000e+00> : vector<8x32xf32>
    %24 = tpu.matmul %23, %7, %cst_17 {dimension_numbers = #tpu.dot_dimension_numbers<[1], [0], [0], [1], [0, 0, 1, 1], [], []>} : vector<8x32xf32>, vector<32x32xf32>, vector<8x32xf32> -> vector<8x32xf32>
    %25 = vector.broadcast %9 : vector<1x32xf32> to vector<8x32xf32>
    %26 = arith.addf %24, %25 : vector<8x32xf32>
    %27 = vector.extract_strided_slice %26 {offsets = [0, 0], sizes = [8, 16], strides = [1, 1]} : vector<8x32xf32> to vector<8x16xf32>
    %28 = vector.extract_strided_slice %26 {offsets = [0, 16], sizes = [8, 16], strides = [1, 1]} : vector<8x32xf32> to vector<8x16xf32>
    %29 = arith.subf %0, %27 : vector<8x16xf32>
    %cst_18 = arith.constant 0.000000e+00 : f32
    %30 = vector.broadcast %cst_18 : f32 to vector<8x16xf32>
    %31 = arith.subf %30, %28 : vector<8x16xf32>
    %32 = math.exp %31 : vector<8x16xf32>
    %33 = arith.mulf %29, %32 : vector<8x16xf32>
    %34 = arith.subf %1, %28 : vector<8x16xf32>
    %c1 = arith.constant 1 : index
    %c0_19 = arith.constant 0 : index
    %c0_20 = arith.constant 0 : index
    %35 = vector.load %arg2[%c1, %c0_19, %c0_20] : memref<3x48x32xf32, #tpu.memory_space<vmem>>, vector<1x48x32xf32>
    %36 = vector.shape_cast %35 : vector<1x48x32xf32> to vector<48x32xf32>
    %c1_21 = arith.constant 1 : index
    %c0_22 = arith.constant 0 : index
    %c0_23 = arith.constant 0 : index
    %37 = vector.load %arg3[%c1_21, %c0_22, %c0_23] : memref<3x2x32xf32, #tpu.memory_space<vmem>>, vector<1x2x32xf32>
    %38 = vector.shape_cast %37 : vector<1x2x32xf32> to vector<2x32xf32>
    %c1_24 = arith.constant 1 : index
    %c0_25 = arith.constant 0 : index
    %c0_26 = arith.constant 0 : index
    %39 = vector.load %arg4[%c1_24, %c0_25, %c0_26] : memref<3x32x32xf32, #tpu.memory_space<vmem>>, vector<1x32x32xf32>
    %40 = vector.shape_cast %39 : vector<1x32x32xf32> to vector<32x32xf32>
    %c1_27 = arith.constant 1 : index
    %c0_28 = arith.constant 0 : index
    %c0_29 = arith.constant 0 : index
    %41 = vector.load %arg5[%c1_27, %c0_28, %c0_29] : memref<3x1x32xf32, #tpu.memory_space<vmem>>, vector<1x1x32xf32>
    %42 = vector.shape_cast %41 : vector<1x1x32xf32> to vector<1x32xf32>
    %43 = vector.extract_strided_slice %36 {offsets = [0, 0], sizes = [16, 32], strides = [1, 1]} : vector<48x32xf32> to vector<16x32xf32>
    %cst_30 = arith.constant dense<0.000000e+00> : vector<8x32xf32>
    %44 = tpu.matmul %33, %43, %cst_30 {dimension_numbers = #tpu.dot_dimension_numbers<[1], [0], [0], [1], [0, 0, 1, 1], [], []>} : vector<8x16xf32>, vector<16x32xf32>, vector<8x32xf32> -> vector<8x32xf32>
    %45 = vector.extract_strided_slice %38 {offsets = [0, 0], sizes = [1, 32], strides = [1, 1]} : vector<2x32xf32> to vector<1x32xf32>
    %46 = vector.broadcast %45 : vector<1x32xf32> to vector<8x32xf32>
    %47 = arith.addf %44, %46 : vector<8x32xf32>
    %cst_31 = arith.constant 0.000000e+00 : f32
    %48 = vector.broadcast %cst_31 : f32 to vector<8x32xf32>
    %49 = arith.maximumf %47, %48 : vector<8x32xf32>
    %50 = vector.extract_strided_slice %36 {offsets = [16, 0], sizes = [32, 32], strides = [1, 1]} : vector<48x32xf32> to vector<32x32xf32>
    %cst_32 = arith.constant dense<0.000000e+00> : vector<8x32xf32>
    %51 = tpu.matmul %49, %50, %cst_32 {dimension_numbers = #tpu.dot_dimension_numbers<[1], [0], [0], [1], [0, 0, 1, 1], [], []>} : vector<8x32xf32>, vector<32x32xf32>, vector<8x32xf32> -> vector<8x32xf32>
    %52 = vector.extract_strided_slice %38 {offsets = [1, 0], sizes = [1, 32], strides = [1, 1]} : vector<2x32xf32> to vector<1x32xf32>
    %53 = vector.broadcast %52 : vector<1x32xf32> to vector<8x32xf32>
    %54 = arith.addf %51, %53 : vector<8x32xf32>
    %cst_33 = arith.constant 0.000000e+00 : f32
    %55 = vector.broadcast %cst_33 : f32 to vector<8x32xf32>
    %56 = arith.maximumf %54, %55 : vector<8x32xf32>
    %cst_34 = arith.constant dense<0.000000e+00> : vector<8x32xf32>
    %57 = tpu.matmul %56, %40, %cst_34 {dimension_numbers = #tpu.dot_dimension_numbers<[1], [0], [0], [1], [0, 0, 1, 1], [], []>} : vector<8x32xf32>, vector<32x32xf32>, vector<8x32xf32> -> vector<8x32xf32>
    %58 = vector.broadcast %42 : vector<1x32xf32> to vector<8x32xf32>
    %59 = arith.addf %57, %58 : vector<8x32xf32>
    %60 = vector.extract_strided_slice %59 {offsets = [0, 0], sizes = [8, 16], strides = [1, 1]} : vector<8x32xf32> to vector<8x16xf32>
    %61 = vector.extract_strided_slice %59 {offsets = [0, 16], sizes = [8, 16], strides = [1, 1]} : vector<8x32xf32> to vector<8x16xf32>
    %62 = arith.subf %33, %60 : vector<8x16xf32>
    %cst_35 = arith.constant 0.000000e+00 : f32
    %63 = vector.broadcast %cst_35 : f32 to vector<8x16xf32>
    %64 = arith.subf %63, %61 : vector<8x16xf32>
    %65 = math.exp %64 : vector<8x16xf32>
    %66 = arith.mulf %62, %65 : vector<8x16xf32>
    %67 = arith.subf %34, %61 : vector<8x16xf32>
    %c2 = arith.constant 2 : index
    %c0_36 = arith.constant 0 : index
    %c0_37 = arith.constant 0 : index
    %68 = vector.load %arg2[%c2, %c0_36, %c0_37] : memref<3x48x32xf32, #tpu.memory_space<vmem>>, vector<1x48x32xf32>
    %69 = vector.shape_cast %68 : vector<1x48x32xf32> to vector<48x32xf32>
    %c2_38 = arith.constant 2 : index
    %c0_39 = arith.constant 0 : index
    %c0_40 = arith.constant 0 : index
    %70 = vector.load %arg3[%c2_38, %c0_39, %c0_40] : memref<3x2x32xf32, #tpu.memory_space<vmem>>, vector<1x2x32xf32>
    %71 = vector.shape_cast %70 : vector<1x2x32xf32> to vector<2x32xf32>
    %c2_41 = arith.constant 2 : index
    %c0_42 = arith.constant 0 : index
    %c0_43 = arith.constant 0 : index
    %72 = vector.load %arg4[%c2_41, %c0_42, %c0_43] : memref<3x32x32xf32, #tpu.memory_space<vmem>>, vector<1x32x32xf32>
    %73 = vector.shape_cast %72 : vector<1x32x32xf32> to vector<32x32xf32>
    %c2_44 = arith.constant 2 : index
    %c0_45 = arith.constant 0 : index
    %c0_46 = arith.constant 0 : index
    %74 = vector.load %arg5[%c2_44, %c0_45, %c0_46] : memref<3x1x32xf32, #tpu.memory_space<vmem>>, vector<1x1x32xf32>
    %75 = vector.shape_cast %74 : vector<1x1x32xf32> to vector<1x32xf32>
    %76 = vector.extract_strided_slice %69 {offsets = [0, 0], sizes = [16, 32], strides = [1, 1]} : vector<48x32xf32> to vector<16x32xf32>
    %cst_47 = arith.constant dense<0.000000e+00> : vector<8x32xf32>
    %77 = tpu.matmul %66, %76, %cst_47 {dimension_numbers = #tpu.dot_dimension_numbers<[1], [0], [0], [1], [0, 0, 1, 1], [], []>} : vector<8x16xf32>, vector<16x32xf32>, vector<8x32xf32> -> vector<8x32xf32>
    %78 = vector.extract_strided_slice %71 {offsets = [0, 0], sizes = [1, 32], strides = [1, 1]} : vector<2x32xf32> to vector<1x32xf32>
    %79 = vector.broadcast %78 : vector<1x32xf32> to vector<8x32xf32>
    %80 = arith.addf %77, %79 : vector<8x32xf32>
    %cst_48 = arith.constant 0.000000e+00 : f32
    %81 = vector.broadcast %cst_48 : f32 to vector<8x32xf32>
    %82 = arith.maximumf %80, %81 : vector<8x32xf32>
    %83 = vector.extract_strided_slice %69 {offsets = [16, 0], sizes = [32, 32], strides = [1, 1]} : vector<48x32xf32> to vector<32x32xf32>
    %cst_49 = arith.constant dense<0.000000e+00> : vector<8x32xf32>
    %84 = tpu.matmul %82, %83, %cst_49 {dimension_numbers = #tpu.dot_dimension_numbers<[1], [0], [0], [1], [0, 0, 1, 1], [], []>} : vector<8x32xf32>, vector<32x32xf32>, vector<8x32xf32> -> vector<8x32xf32>
    %85 = vector.extract_strided_slice %71 {offsets = [1, 0], sizes = [1, 32], strides = [1, 1]} : vector<2x32xf32> to vector<1x32xf32>
    %86 = vector.broadcast %85 : vector<1x32xf32> to vector<8x32xf32>
    %87 = arith.addf %84, %86 : vector<8x32xf32>
    %cst_50 = arith.constant 0.000000e+00 : f32
    %88 = vector.broadcast %cst_50 : f32 to vector<8x32xf32>
    %89 = arith.maximumf %87, %88 : vector<8x32xf32>
    %cst_51 = arith.constant dense<0.000000e+00> : vector<8x32xf32>
    %90 = tpu.matmul %89, %73, %cst_51 {dimension_numbers = #tpu.dot_dimension_numbers<[1], [0], [0], [1], [0, 0, 1, 1], [], []>} : vector<8x32xf32>, vector<32x32xf32>, vector<8x32xf32> -> vector<8x32xf32>
    %91 = vector.broadcast %75 : vector<1x32xf32> to vector<8x32xf32>
    %92 = arith.addf %90, %91 : vector<8x32xf32>
    %93 = vector.extract_strided_slice %92 {offsets = [0, 0], sizes = [8, 16], strides = [1, 1]} : vector<8x32xf32> to vector<8x16xf32>
    %94 = vector.extract_strided_slice %92 {offsets = [0, 16], sizes = [8, 16], strides = [1, 1]} : vector<8x32xf32> to vector<8x16xf32>
    %95 = arith.subf %66, %93 : vector<8x16xf32>
    %cst_52 = arith.constant 0.000000e+00 : f32
    %96 = vector.broadcast %cst_52 : f32 to vector<8x16xf32>
    %97 = arith.subf %96, %94 : vector<8x16xf32>
    %98 = math.exp %97 : vector<8x16xf32>
    %99 = arith.mulf %95, %98 : vector<8x16xf32>
    %100 = arith.subf %67, %94 : vector<8x16xf32>
    %c0_53 = arith.constant 0 : index
    %c0_54 = arith.constant 0 : index
    %101 = vector.load %arg6[%c0_53, %c0_54] : memref<48x32xf32, #tpu.memory_space<vmem>>, vector<48x32xf32>
    %c0_55 = arith.constant 0 : index
    %c0_56 = arith.constant 0 : index
    %102 = vector.load %arg7[%c0_55, %c0_56] : memref<2x32xf32, #tpu.memory_space<vmem>>, vector<2x32xf32>
    %103 = vector.extract_strided_slice %101 {offsets = [0, 0], sizes = [16, 32], strides = [1, 1]} : vector<48x32xf32> to vector<16x32xf32>
    %cst_57 = arith.constant dense<0.000000e+00> : vector<8x32xf32>
    %104 = tpu.matmul %99, %103, %cst_57 {dimension_numbers = #tpu.dot_dimension_numbers<[1], [0], [0], [1], [0, 0, 1, 1], [], []>} : vector<8x16xf32>, vector<16x32xf32>, vector<8x32xf32> -> vector<8x32xf32>
    %105 = vector.extract_strided_slice %102 {offsets = [0, 0], sizes = [1, 32], strides = [1, 1]} : vector<2x32xf32> to vector<1x32xf32>
    %106 = vector.broadcast %105 : vector<1x32xf32> to vector<8x32xf32>
    %107 = arith.addf %104, %106 : vector<8x32xf32>
    %cst_58 = arith.constant 0.000000e+00 : f32
    %108 = vector.broadcast %cst_58 : f32 to vector<8x32xf32>
    %109 = arith.maximumf %107, %108 : vector<8x32xf32>
    %110 = vector.extract_strided_slice %101 {offsets = [16, 0], sizes = [32, 32], strides = [1, 1]} : vector<48x32xf32> to vector<32x32xf32>
    %cst_59 = arith.constant dense<0.000000e+00> : vector<8x32xf32>
    %111 = tpu.matmul %109, %110, %cst_59 {dimension_numbers = #tpu.dot_dimension_numbers<[1], [0], [0], [1], [0, 0, 1, 1], [], []>} : vector<8x32xf32>, vector<32x32xf32>, vector<8x32xf32> -> vector<8x32xf32>
    %112 = vector.extract_strided_slice %102 {offsets = [1, 0], sizes = [1, 32], strides = [1, 1]} : vector<2x32xf32> to vector<1x32xf32>
    %113 = vector.broadcast %112 : vector<1x32xf32> to vector<8x32xf32>
    %114 = arith.addf %111, %113 : vector<8x32xf32>
    %cst_60 = arith.constant 0.000000e+00 : f32
    %115 = vector.broadcast %cst_60 : f32 to vector<8x32xf32>
    %116 = arith.maximumf %114, %115 : vector<8x32xf32>
    %c0_61 = arith.constant 0 : index
    %c0_62 = arith.constant 0 : index
    %117 = vector.load %arg8[%c0_61, %c0_62] : memref<32x96xf32, #tpu.memory_space<vmem>>, vector<32x96xf32>
    %cst_63 = arith.constant dense<0.000000e+00> : vector<8x96xf32>
    %118 = tpu.matmul %116, %117, %cst_63 {dimension_numbers = #tpu.dot_dimension_numbers<[1], [0], [0], [1], [0, 0, 1, 1], [], []>} : vector<8x32xf32>, vector<32x96xf32>, vector<8x96xf32> -> vector<8x96xf32>
    %c0_64 = arith.constant 0 : index
    %c0_65 = arith.constant 0 : index
    %119 = vector.load %arg9[%c0_64, %c0_65] : memref<1x96xf32, #tpu.memory_space<vmem>>, vector<1x96xf32>
    %120 = vector.broadcast %119 : vector<1x96xf32> to vector<8x96xf32>
    %121 = arith.addf %118, %120 : vector<8x96xf32>
    %122 = vector.extract_strided_slice %121 {offsets = [0, 0], sizes = [8, 32], strides = [1, 1]} : vector<8x96xf32> to vector<8x32xf32>
    %123 = vector.extract_strided_slice %121 {offsets = [0, 32], sizes = [8, 32], strides = [1, 1]} : vector<8x96xf32> to vector<8x32xf32>
    %124 = vector.extract_strided_slice %121 {offsets = [0, 64], sizes = [8, 32], strides = [1, 1]} : vector<8x96xf32> to vector<8x32xf32>
    %125 = tpu.concatenate %99, %99 in 1 : vector<8x16xf32>, vector<8x16xf32> -> vector<8x32xf32>
    %126 = tpu.concatenate %100, %100 in 1 : vector<8x16xf32>, vector<8x16xf32> -> vector<8x32xf32>
    %127 = arith.subf %125, %122 : vector<8x32xf32>
    %cst_66 = arith.constant 0.000000e+00 : f32
    %128 = vector.broadcast %cst_66 : f32 to vector<8x32xf32>
    %129 = arith.subf %128, %123 : vector<8x32xf32>
    %130 = math.exp %129 : vector<8x32xf32>
    %131 = arith.mulf %127, %130 : vector<8x32xf32>
    %132 = arith.subf %126, %123 : vector<8x32xf32>
    %133 = vector.extract_strided_slice %124 {offsets = [0, 0], sizes = [8, 16], strides = [1, 1]} : vector<8x32xf32> to vector<8x16xf32>
    %134 = vector.extract_strided_slice %124 {offsets = [0, 16], sizes = [8, 16], strides = [1, 1]} : vector<8x32xf32> to vector<8x16xf32>
    %135 = arith.maximumf %133, %134 : vector<8x16xf32>
    %cst_67 = arith.constant 0.000000e+00 : f32
    %136 = vector.broadcast %cst_67 : f32 to vector<8x16xf32>
    %137 = arith.subf %133, %135 : vector<8x16xf32>
    %138 = math.exp %137 : vector<8x16xf32>
    %139 = arith.addf %136, %138 : vector<8x16xf32>
    %140 = arith.subf %134, %135 : vector<8x16xf32>
    %141 = math.exp %140 : vector<8x16xf32>
    %142 = arith.addf %139, %141 : vector<8x16xf32>
    %143 = math.log %142 : vector<8x16xf32>
    %144 = arith.addf %135, %143 : vector<8x16xf32>
    %145 = arith.subf %133, %144 : vector<8x16xf32>
    %146 = arith.subf %134, %144 : vector<8x16xf32>
    %147 = tpu.concatenate %145, %146 in 1 : vector<8x16xf32>, vector<8x16xf32> -> vector<8x32xf32>
    %148 = tpu.concatenate %131, %132, %147 in 1 : vector<8x32xf32>, vector<8x32xf32>, vector<8x32xf32> -> vector<8x96xf32>
    %c0_68 = arith.constant 0 : index
    %c0_69 = arith.constant 0 : index
    %149 = vector.load %arg10[%c0_68, %c0_69] : memref<8x96xf32, #tpu.memory_space<vmem>>, vector<8x96xf32>
    tpu.vector_store %arg10[%c0_68, %c0_69], %148 {strides = array<i32>} : memref<8x96xf32, #tpu.memory_space<vmem>>, vector<8x96xf32>,
    return
  }
  func.func @transform_0(%arg0: i32) -> (i32, i32) {
    %c0_i32 = arith.constant 0 : i32
    %c0_i32_0 = arith.constant 0 : i32
    return %arg0, %c0_i32 : i32, i32
  }
  func.func @transform_1(%arg0: i32) -> (i32, i32, i32) {
    %c0_i32 = arith.constant 0 : i32
    %c0_i32_0 = arith.constant 0 : i32
    %c0_i32_1 = arith.constant 0 : i32
    %c0_i32_2 = arith.constant 0 : i32
    return %c0_i32, %c0_i32_0, %c0_i32_1 : i32, i32, i32
  }
  func.func @transform_2(%arg0: i32) -> (i32, i32, i32) {
    %c0_i32 = arith.constant 0 : i32
    %c0_i32_0 = arith.constant 0 : i32
    %c0_i32_1 = arith.constant 0 : i32
    %c0_i32_2 = arith.constant 0 : i32
    return %c0_i32, %c0_i32_0, %c0_i32_1 : i32, i32, i32
  }
  func.func @transform_3(%arg0: i32) -> (i32, i32, i32) {
    %c0_i32 = arith.constant 0 : i32
    %c0_i32_0 = arith.constant 0 : i32
    %c0_i32_1 = arith.constant 0 : i32
    %c0_i32_2 = arith.constant 0 : i32
    return %c0_i32, %c0_i32_0, %c0_i32_1 : i32, i32, i32
  }
  func.func @transform_4(%arg0: i32) -> (i32, i32, i32) {
    %c0_i32 = arith.constant 0 : i32
    %c0_i32_0 = arith.constant 0 : i32
    %c0_i32_1 = arith.constant 0 : i32
    %c0_i32_2 = arith.constant 0 : i32
    return %c0_i32, %c0_i32_0, %c0_i32_1 : i32, i32, i32
  }
  func.func @transform_5(%arg0: i32) -> (i32, i32) {
    %c0_i32 = arith.constant 0 : i32
    %c0_i32_0 = arith.constant 0 : i32
    %c0_i32_1 = arith.constant 0 : i32
    return %c0_i32, %c0_i32_0 : i32, i32
  }
  func.func @transform_6(%arg0: i32) -> (i32, i32) {
    %c0_i32 = arith.constant 0 : i32
    %c0_i32_0 = arith.constant 0 : i32
    %c0_i32_1 = arith.constant 0 : i32
    return %c0_i32, %c0_i32_0 : i32, i32
  }
  func.func @transform_7(%arg0: i32) -> (i32, i32) {
    %c0_i32 = arith.constant 0 : i32
    %c0_i32_0 = arith.constant 0 : i32
    %c0_i32_1 = arith.constant 0 : i32
    return %c0_i32, %c0_i32_0 : i32, i32
  }
  func.func @transform_8(%arg0: i32) -> (i32, i32) {
    %c0_i32 = arith.constant 0 : i32
    %c0_i32_0 = arith.constant 0 : i32
    %c0_i32_1 = arith.constant 0 : i32
    return %c0_i32, %c0_i32_0 : i32, i32
  }
  func.func @transform_9(%arg0: i32) -> (i32, i32) {
    %c0_i32 = arith.constant 0 : i32
    %c0_i32_0 = arith.constant 0 : i32
    return %arg0, %c0_i32 : i32, i32
  }
}

</mosaic_0001>

<bundles_post_ra>
// kernel: tpu_custom_call.1
= control target key start
LH: loop header
LB: loop body
LE: loop exit
PB: predicated region body
PF: predicated region fallthrough
CT: control target
= control target key end

     0   :  { %v1464_v2 = vmov 0.0|0.0   ;;  %vm1465_vm0 = vmmov 0   ;;  %v1466_v4 = vmov 0.0   ;;  %s1781_s0 = inlined_call_operand.vmem [shape: f32[8,16], index: 0, kind: input, shape index: {}]   ;;  %s1782_s1 = inlined_call_operand.vmem [shape: f32[3,48,32], index: 1, kind: input, shape index: {}]   ;;  %s1783_s2 = inlined_call_operand.vmem [shape: f32[3,2,32], index: 2, kind: input, shape index: {}]   ;;  %s1784_s3 = inlined_call_operand.vmem [shape: f32[3,32,32], index: 3, kind: input, shape index: {}]   ;;  %s1785_s4 = inlined_call_operand.vmem [shape: f32[3,1,32], index: 4, kind: input, shape index: {}]   ;;  %s1786_s5 = inlined_call_operand.vmem [shape: f32[48,32], index: 5, kind: input, shape index: {}]   ;;  %s1787_s6 = inlined_call_operand.vmem [shape: f32[2,32], index: 6, kind: input, shape index: {}]   ;;  %s1788_s7 = inlined_call_operand.vmem [shape: f32[32,96], index: 7, kind: input, shape index: {}]   ;;  %s1789_s8 = inlined_call_operand.vmem [shape: f32[1,96], index: 8, kind: input, shape index: {}]   ;;  %s1790_s9 = inlined_call_operand.hbm [shape: f32[8,96], index: 9, kind: output, shape index: {}]  }
   0x1   :  { %v34_v0 = vld [vmem:[%s1782_s1] sm:$0xff]  ;;  %v35_v1 = vld [vmem:[%s1782_s1 + $0x8] sm:$0xff]  ;;  %1357 = vmatprep.subr.bf16.mxu0 %v1464_v2  ;;  %1245 = vmatprep.mubr.msk.f32.mxu0 %vm1465_vm0, %v1466_v4  ;;  %v36_v5 = vld [vmem:[%s1782_s1 + $0x10] sm:$0xff] }
   0x2   :  { %v1358_v3 = vpack.c.bf16 %v35_v1, %v34_v0  ;;  %v37_v6 = vld [vmem:[%s1782_s1 + $0x18] sm:$0xff]  ;;  %1360 = vmatprep.subr.bf16.mxu1 %v1464_v2  ;;  %1256 = vmatprep.mubr.msk.f32.mxu1 %vm1465_vm0, %v1466_v4 }
   0x3   :  { %v1361_v7 = vpack.c.bf16 %v37_v6, %v36_v5 }
   0x4   :  { %14 = vsyncpa [#allocation3], 0  ;;  %1359 = vmatpush3.bf16.msra.mxu0 %v1358_v3  ;;  %v1544_v8 = vld [vmem:[%s1781_s0] sm:$0xff]  ;;  %vm50_vm1 = vcmask 130048   ;;  %v39_v10 = vld [vmem:[%s1782_s1 + $0x28] sm:$0xff]  ;;  %v46_v15 = vlaneseq  ;;  %vm129_vm2 = vcmask 261120  }
   0x5   :  { %1362 = vmatpush3.bf16.msra.mxu1 %v1361_v7  ;;  %1366 = vmatprep.subr.bf16.mxu0 %v1464_v2  ;;  %v38_v9 = vld [vmem:[%s1782_s1 + $0x20] sm:$0xff]  ;;  %v42_v13 = vld [vmem:[%s1784_s3 + $0x8] sm:$0xff]  ;;  %v43_v24 = vld [vmem:[%s1784_s3 + $0x10] sm:$0xff]  ;;  %s1467_s21 = smov 112   ;;  %s1470_s15 = smov 96   ;;  %vm1131_vm3 = vcmask 523264  }
   0x6   :  { %1363 = vmatprep.subr.bf16.mxu1 %v1464_v2  ;;  %v1364_v11 = vpack.c.bf16 %v39_v10, %v38_v9  ;;  %v41_v12 = vld [vmem:[%s1784_s3] sm:$0xff]  ;;  %v47_v16 = vshrl.u32 %v46_v15, 7  ;;  %v44_v25 = vld [vmem:[%s1784_s3 + $0x18] sm:$0xff]  ;;  %v1153_v33 = vld [vmem:[%s1782_s1 + $0x30] sm:$0xff]  ;;  %vm1133_vm4 = vcmask 785408  }
   0x7   :  { %1246 = vmatmul.mubr.msk.f32.vlgmr.msra.gmra.mrb[0].mxu0 %vm50_vm1, %v1544_v8  ;;  %v1367_v14 = vpack.c.bf16 %v42_v13, %v41_v12  ;;  %v40_v18 = vld [vmem:[%s1783_s2] sm:$0x3]  ;;  %v1370_v26 = vpack.c.bf16 %v44_v25, %v43_v24  ;;  %v1154_v34 = vld [vmem:[%s1782_s1 + $0x38] sm:$0xff]  ;;  %v1156_v43 = vld [vmem:[%s1782_s1 + $0x48] sm:$0xff] }
   0x8   :  { %1267 = vmatprep.mubr.msk.f32.mxu0 %vm1465_vm0, %v1466_v4  ;;  %v1566_v17 = vsub.s32 0, %v47_v16  ;;  %v1582_v27 = vsub.s32 1, %v47_v16  ;;  %v1373_v35 = vpack.c.bf16 %v1154_v34, %v1153_v33  ;;  %v1151_v36 = vld [vmem:[%s1785_s4] ss:$0 sm:$0xff]  ;;  %v1157_v49 = vld [vmem:[%s1782_s1 + $0x50] sm:$0xff]  ;;  %v1158_v50 = vld [vmem:[%s1782_s1 + $0x58] sm:$0xff] }
   0x9   :  { %1365 = vmatpush3.bf16.msra.mxu1 %v1364_v11  ;;  %1368 = vmatpush3.bf16.msra.mxu0 %v1367_v14  ;;  %v1155_v42 = vld [vmem:[%s1782_s1 + $0x40] sm:$0xff]  ;;  %v1379_v51 = vpack.c.bf16 %v1158_v50, %v1157_v49  ;;  %v1161_v53 = vld [vmem:[%s1784_s3 + $0x28] sm:$0xff]  ;;  %v1162_v61 = vld [vmem:[%s1784_s3 + $0x30] sm:$0xff] }
   0xa   :  { %1372 = vmatprep.subr.bf16.mxu1 %v1464_v2  ;;  %1369 = vmatprep.subr.bf16.mxu0 %v1464_v2  ;;  %v49_v19 = vrot.slane %v40_v18, %v1566_v17  ;;  %v128_v28 = vrot.slane %v40_v18, %v1582_v27  ;;  %v1376_v44 = vpack.c.bf16 %v1156_v43, %v1155_v42  ;;  %v1160_v52 = vld [vmem:[%s1784_s3 + $0x20] sm:$0xff]  ;;  %v1163_v62 = vld [vmem:[%s1784_s3 + $0x38] sm:$0xff]  ;;  %v1171_v16 = vld [vmem:[%s1782_s1 + $0x70] sm:$0xff] }
   0xb   :  { %v1382_v54 = vpack.c.bf16 %v1161_v53, %v1160_v52  ;;  %v1159_v55 = vld [vmem:[%s1783_s2 + $0x2] sm:$0x3]  ;;  %v1385_v63 = vpack.c.bf16 %v1163_v62, %v1162_v61  ;;  %v1167_v10 = vld [vmem:[%s1785_s4 + $0x1] ss:$0 sm:$0xff]  ;;  %v1172_v18 = vld [vmem:[%s1782_s1 + $0x78] sm:$0xff] }
   0xc   :  { %v311_v56 = vrot.slane %v1159_v55, %v1566_v17  ;;  %v389_v0 = vrot.slane %v1159_v55, %v1582_v27  ;;  %v1169_v7 = vld [vmem:[%s1782_s1 + $0x60] sm:$0xff]  ;;  %v1174_v25 = vld [vmem:[%s1782_s1 + $0x88] sm:$0xff] }
   0xd   :  { %1371 = vmatpush3.bf16.msra.mxu0 %v1370_v26  ;;  %v1173_v24 = vld [vmem:[%s1782_s1 + $0x80] sm:$0xff] }
   0xe   :  { %1375 = vmatprep.subr.bf16.mxu0 %v1464_v2  ;;  %v1394_v26 = vpack.c.bf16 %v1174_v25, %v1173_v24  ;;  %v1183_v50 = vld [vmem:[%s1785_s4 + $0x2] ss:$0 sm:$0xff] }
  0xda   :  { %v120_v20 = vpop.f32.mrb[0].mxu0 }
  0xdb   :  { %v121_v21 = vadd.f32 %v120_v20, %v49_v19  ;;  %v1247_v22 = vpop.f32.mrb[1].mxu0  ;;  %v1391_v19 = vpack.c.bf16 %v1172_v18, %v1171_v16 }
  0xdd   :  { %v124_v23 = vmax.f32 %v121_v21, 0.0 }
  0xdf   :  { %1257 = vmatmul.mubr.msk.f32.vlgmr.msra.gmra.mrb[0].mxu1 %vm129_vm2, %v124_v23 }
  0xe0   :  { %1274 = vmatprep.mubr.msk.f32.mxu1 %vm1465_vm0, %v1466_v4  ;;  %1374 = vmatpush3.bf16.msra.mxu1 %v1373_v35 }
  0xe1   :  { %1381 = vmatprep.subr.bf16.mxu1 %v1464_v2 }
 0x1b2   :  { %v199_v29 = vpop.f32.mrb[0].mxu1 }
 0x1b3   :  { %v200_v30 = vadd.f32 %v199_v29, %v128_v28  ;;  %v1258_v31 = vpop.f32.mrb[1].mxu1  ;;  %v1176_v28 = vld [vmem:[%s1784_s3 + $0x40] sm:$0xff]  ;;  %v1177_v29 = vld [vmem:[%s1784_s3 + $0x48] sm:$0xff] }
 0x1b4   :  { %v1175_v31 = vld [vmem:[%s1783_s2 + $0x4] sm:$0x3]  ;;  %s1472_s2 = smov [#allocation2]  }
 0x1b5   :  { %v203_v32 = vmax.f32 %v200_v30, 0.0  ;;  %v1397_v30 = vpack.c.bf16 %v1177_v29, %v1176_v28  ;;  %v650_v42 = vrot.slane %v1175_v31, %v1582_v27  ;;  %s1141_s16 = sshll.u32 %s1472_s2, 4  ;;  %s1142_s16 = int_to_ptr.vmem [resolvable:$true] %s1141_s16 }
 0x1b6   :  { %p1445_p1 = scmp.lt.s32.totalorder %s1142_s16, %s1142_s16 }
 0x1b7   :  { %1268 = vmatmul.mubr.msk.f32.vlgmr.msra.gmra.mrb[2].mxu0 %vm129_vm2, %v203_v32  ;;  %v572_v32 = vrot.slane %v1175_v31, %v1566_v17 }
 0x1b8   :  { %1285 = vmatprep.mubr.msk.f32.mxu0 %vm1465_vm0, %v1466_v4  ;;  %1377 = vmatpush3.bf16.msra.mxu0 %v1376_v44 }
 0x1b9   :  { %1378 = vmatprep.subr.bf16.mxu0 %v1464_v2 }
 0x1bc   :  { %1380 = vmatpush3.bf16.msra.mxu0 %v1379_v51 }
 0x1bd   :  { %1387 = vmatprep.subr.bf16.mxu0 %v1464_v2 }
 0x28a   :  { %v279_v37 = vpop.f32.mrb[2].mxu0 }
 0x28b   :  { %v1598_v38 = vadd.f32 %v1151_v36, %v279_v37  ;;  %v1269_v39 = vpop.f32.mrb[3].mxu0  ;;  %v1178_v37 = vld [vmem:[%s1784_s3 + $0x50] sm:$0xff] }
 0x28c   :  { %v1179_v39 = vld [vmem:[%s1784_s3 + $0x58] sm:$0xff]  ;;  %s1440_s3 = scalar_lea.vmem %s1142_s16, 128 }
 0x28d   :  { %v284_v40 = vsub.f32 0.0, %v1598_v38  ;;  %v283_v46 = vsub.f32 %v1544_v8, %v1598_v38  ;;  %v1170_v8 = vld [vmem:[%s1782_s1 + $0x68] sm:$0xff]  ;;  %p1441_p0 = scmp.ne.s32.totalorder %s1142_s16, %s1440_s3  ;;  %p1446_p2 = scmp.lt.s32.totalorder %s1440_s3, %s1440_s3 }
 0x28e   :  { %v1388_v9 = vpack.c.bf16 %v1170_v8, %v1169_v7 }
 0x28f   :  { %v285_v41 = vmul.f32 1.442695, %v284_v40  ;;  %p1447_p3 = por %p1446_p2, %p1445_p1 }
 0x291   :  { %1426 = vpow2.f32 %v285_v41  ;;  %v1400_v41 = vpack.c.bf16 %v1179_v39, %v1178_v37  ;;  %p1448_p4 = pnand %p1447_p3, %p1441_p0 }
 0x29b   :  { %v1427_v45 = vpop.eup %1426 }
 0x29c   :  { %288 = vrot.lane.b32.xlu0 %v1427_v45, %s1467_s21 }
 0x30e   :  { %v289_v47 = vpop.permute.xlu0 %288 }
 0x30f   :  { %v291_v48 = vmul.f32 %v289_v47, %v283_v46  ;;  %v814_v47 = vld [vmem:[%s1786_s5] sm:$0xff] }
 0x311   :  { %1275 = vmatmul.mubr.msk.f32.vlgmr.msra.gmra.mrb[2].mxu1 %vm50_vm1, %v291_v48 }
 0x312   :  { %1296 = vmatprep.mubr.msk.f32.mxu1 %vm1465_vm0, %v1466_v4  ;;  %1383 = vmatpush3.bf16.msra.mxu1 %v1382_v54 }
 0x313   :  { %1384 = vmatprep.subr.bf16.mxu1 %v1464_v2 }
 0x316   :  { %1386 = vmatpush3.bf16.msra.mxu1 %v1385_v63  ;;  %v818_v63 = vld [vmem:[%s1786_s5 + $0x20] sm:$0xff] }
 0x317   :  { %1390 = vmatprep.subr.bf16.mxu1 %v1464_v2 }
 0x3e4   :  { %v381_v57 = vpop.f32.mrb[2].mxu1 }
 0x3e5   :  { %v382_v58 = vadd.f32 %v381_v57, %v311_v56  ;;  %v1276_v59 = vpop.f32.mrb[3].mxu1 }
 0x3e6   :  { %v817_v59 = vld [vmem:[%s1786_s5 + $0x18] sm:$0xff] }
 0x3e7   :  { %v385_v60 = vmax.f32 %v382_v58, 0.0  ;;  %v816_v58 = vld [vmem:[%s1786_s5 + $0x10] sm:$0xff] }
 0x3e9   :  { %1286 = vmatmul.mubr.msk.f32.vlgmr.msra.gmra.mrb[4].mxu0 %vm129_vm2, %v385_v60  ;;  %v1406_v60 = vpack.c.bf16 %v817_v59, %v816_v58 }
 0x3ea   :  { %1303 = vmatprep.mubr.msk.f32.mxu0 %vm1465_vm0, %v1466_v4  ;;  %1389 = vmatpush3.bf16.msra.mxu0 %v1388_v9 }
 0x3eb   :  { %1396 = vmatprep.subr.bf16.mxu0 %v1464_v2 }
 0x4bc   :  { %v459_v1 = vpop.f32.mrb[4].mxu0 }
 0x4bd   :  { %v460_v3 = vadd.f32 %v459_v1, %v389_v0  ;;  %v1287_v5 = vpop.f32.mrb[5].mxu0  ;;  %v819_v0 = vld [vmem:[%s1786_s5 + $0x28] sm:$0xff] }
 0x4be   :  { %v1409_v1 = vpack.c.bf16 %v819_v0, %v818_v63  ;;  %v978_v5 = vld [vmem:[%s1788_s7 + $0x8] sm:$0xff] }
 0x4bf   :  { %v463_v6 = vmax.f32 %v460_v3, 0.0  ;;  %v977_v3 = vld [vmem:[%s1788_s7] sm:$0xff] }
 0x4c1   :  { %1297 = vmatmul.mubr.msk.f32.vlgmr.msra.gmra.mrb[4].mxu1 %vm129_vm2, %v463_v6  ;;  %v1412_v6 = vpack.c.bf16 %v978_v5, %v977_v3 }
 0x4c2   :  { %1314 = vmatprep.mubr.msk.f32.mxu1 %vm1465_vm0, %v1466_v4  ;;  %1392 = vmatpush3.bf16.msra.mxu1 %v1391_v19  ;;  %v1187_v19 = vld [vmem:[%s1789_s8] ss:$0 sm:$0xff]  ;;  %s1469_s8 = smov 64  }
 0x4c3   :  { %1393 = vmatprep.subr.bf16.mxu1 %v1464_v2 }
 0x4c6   :  { %1395 = vmatpush3.bf16.msra.mxu1 %v1394_v26 }
 0x4c7   :  { %1402 = vmatprep.subr.bf16.mxu1 %v1464_v2 }
 0x594   :  { %v539_v11 = vpop.f32.mrb[4].mxu1 }
 0x595   :  { %v540_v12 = vadd.f32 %v1167_v10, %v539_v11  ;;  %v1298_v13 = vpop.f32.mrb[5].mxu1 }
 0x597   :  { %v544_v14 = vsub.f32 0.0, %v540_v12  ;;  %v543_v21 = vsub.f32 %v291_v48, %v540_v12  ;;  %v815_v48 = vld [vmem:[%s1786_s5 + $0x8] sm:$0xff]  ;;  %v552_v52 = vsub.f32 %v284_v40, %v540_v12  ;;  %v979_v12 = vld [vmem:[%s1788_s7 + $0x10] sm:$0xff] }
 0x598   :  { %v1403_v49 = vpack.c.bf16 %v815_v48, %v814_v47 }
 0x599   :  { %v545_v15 = vmul.f32 1.442695, %v544_v14 }
 0x59b   :  { %1428 = vpow2.f32 %v545_v15 }
 0x5a5   :  { %v1429_v20 = vpop.eup %1428 }
 0x5a6   :  { %548 = vrot.lane.b32.xlu0 %v1429_v20, %s1467_s21 }
 0x618   :  { %v549_v22 = vpop.permute.xlu0 %548 }
 0x619   :  { %v551_v23 = vmul.f32 %v549_v22, %v543_v21 }
 0x61b   :  { %1304 = vmatmul.mubr.msk.f32.vlgmr.msra.gmra.mrb[6].mxu0 %vm50_vm1, %v551_v23 }
 0x61c   :  { %1325 = vmatprep.mubr.msk.f32.mxu0 %vm1465_vm0, %v1466_v4  ;;  %1398 = vmatpush3.bf16.msra.mxu0 %v1397_v30 }
 0x61d   :  { %1399 = vmatprep.subr.bf16.mxu0 %v1464_v2 }
 0x620   :  { %1401 = vmatpush3.bf16.msra.mxu0 %v1400_v41 }
 0x621   :  { %1405 = vmatprep.subr.bf16.mxu0 %v1464_v2 }
 0x6ee   :  { %v642_v33 = vpop.f32.mrb[6].mxu0 }
 0x6ef   :  { %v643_v34 = vadd.f32 %v642_v33, %v572_v32  ;;  %v1305_v35 = vpop.f32.mrb[7].mxu0 }
 0x6f1   :  { %v646_v36 = vmax.f32 %v643_v34, 0.0 }
 0x6f3   :  { %1315 = vmatmul.mubr.msk.f32.vlgmr.msra.gmra.mrb[6].mxu1 %vm129_vm2, %v646_v36 }
 0x6f4   :  { %1332 = vmatprep.mubr.msk.f32.mxu1 %vm1465_vm0, %v1466_v4  ;;  %1404 = vmatpush3.bf16.msra.mxu1 %v1403_v49 }
 0x6f5   :  { %1411 = vmatprep.subr.bf16.mxu1 %v1464_v2 }
 0x7c6   :  { %v720_v43 = vpop.f32.mrb[6].mxu1 }
 0x7c7   :  { %v721_v44 = vadd.f32 %v720_v43, %v650_v42  ;;  %v1316_v45 = vpop.f32.mrb[7].mxu1 }
 0x7c9   :  { %v724_v46 = vmax.f32 %v721_v44, 0.0 }
 0x7cb   :  { %1326 = vmatmul.mubr.msk.f32.vlgmr.msra.gmra.mrb[8].mxu0 %vm129_vm2, %v724_v46 }
 0x7cc   :  { %1343 = vmatprep.mubr.msk.f32.mxu0 %vm1465_vm0, %v1466_v4  ;;  %1407 = vmatpush3.bf16.msra.mxu0 %v1406_v60 }
 0x7cd   :  { %1408 = vmatprep.subr.bf16.mxu0 %v1464_v2 }
 0x7d0   :  { %1410 = vmatpush3.bf16.msra.mxu0 %v1409_v1 }
 0x89e   :  { %v800_v51 = vpop.f32.mrb[8].mxu0 }
 0x89f   :  { %v801_v53 = vadd.f32 %v1183_v50, %v800_v51  ;;  %v1327_v54 = vpop.f32.mrb[9].mxu0 }
 0x8a1   :  { %v805_v55 = vsub.f32 0.0, %v801_v53  ;;  %v1713_v56 = vsub.f32 %v552_v52, %v801_v53  ;;  %v804_v40 = vsub.f32 %v551_v23, %v801_v53 }
 0x8a3   :  { %v806_v57 = vmul.f32 1.442695, %v805_v55 }
 0x8a5   :  { %1430 = vpow2.f32 %v806_v57 }
 0x8af   :  { %v1431_v38 = vpop.eup %1430 }
 0x8b0   :  { %809 = vrot.lane.b32.xlu1 %v1431_v38, %s1467_s21 }
 0x922   :  { %v810_v61 = vpop.permute.xlu1 %809 }
 0x923   :  { %v1723_v62 = vmul.f32 %v810_v61, %v804_v40 }
 0x925   :  { %1333 = vmatmul.mubr.msk.f32.vlgmr.msra.gmra.mrb[8].mxu1 %vm50_vm1, %v1723_v62 }
 0x926   :  { %1354 = vmatprep.mubr.msk.f32.mxu1 %vm1465_vm0, %v1466_v4  ;;  %1413 = vmatpush3.bf16.msra.mxu1 %v1412_v6  ;;  %v820_v4 = vld [vmem:[%s1787_s6] sm:$0x3] }
 0x927   :  { %1414 = vmatprep.subr.bf16.mxu1 %v1464_v2  ;;  %v824_v7 = vrot.slane %v820_v4, %v1566_v17  ;;  %v980_v2 = vld [vmem:[%s1788_s7 + $0x18] sm:$0xff]  ;;  %v902_v14 = vrot.slane %v820_v4, %v1582_v27  ;;  %s1468_s7 = smov 16  }
 0x928   :  { %v1415_v13 = vpack.c.bf16 %v980_v2, %v979_v12 }
 0x92a   :  { %1416 = vmatpush3.bf16.msra.mxu1 %v1415_v13 }
 0x9f8   :  { %v894_v8 = vpop.f32.mrb[8].mxu1 }
 0x9f9   :  { %v895_v9 = vadd.f32 %v894_v8, %v824_v7  ;;  %v1334_v10 = vpop.f32.mrb[9].mxu1 }
 0x9fb   :  { %v898_v11 = vmax.f32 %v895_v9, 0.0 }
 0x9fd   :  { %1344 = vmatmul.mubr.msk.f32.vlgmr.msra.gmra.mrb[10].mxu0 %vm129_vm2, %v898_v11 }
 0xad0   :  { %v972_v15 = vpop.f32.mrb[10].mxu0 }
 0xad1   :  { %v973_v17 = vadd.f32 %v972_v15, %v902_v14  ;;  %v1345_v16 = vpop.f32.mrb[11].mxu0 }
 0xad3   :  { %v976_v18 = vmax.f32 %v973_v17, 0.0 }
 0xad5   :  { %1355 = vmatmul.mubr.msk.f32.vlgmr.msra.gmra.mrb[10].mxu1 %vm129_vm2, %v976_v18 }
 0xba8   :  { %v1057_v20 = vpop.f32.mrb[10].mxu1 }
 0xba9   :  { %v1058_v21 = vadd.f32 %v1187_v19, %v1057_v20  ;;  %v1356_v22 = vpop.f32.mrb[11].mxu1 }
 0xbab   :  { %1084 = vrot.lane.b32.xlu1 %v1058_v21, %s1467_s21  ;;  %v1071_v39 = vsub.f32 0.0, %v1058_v21 }
 0xbad   :  { %v1072_v41 = vmul.f32 1.442695, %v1071_v39 }
 0xc1d   :  { %v1085_v23 = vpop.permute.xlu1 %1084 }
 0xc1e   :  { %v1087_v24 = vmax.f32 %v1058_v21, %v1085_v23 }
 0xc20   :  { %1093 = vrot.lane.b32.xlu0 %v1087_v24, %s1468_s7  ;;  %v1088_v29 = vsub.f32 %v1058_v21, %v1087_v24 }
 0xc22   :  { %v1089_v30 = vmul.f32 1.442695, %v1088_v29 }
 0xc92   :  { %v1094_v27 = vpop.permute.xlu0 %1093 }
 0xc93   :  { %v1096_v25 = vsub.f32 %v1058_v21, %v1094_v27 }
 0xc95   :  { %v1097_v26 = vmul.f32 1.442695, %v1096_v25 }
 0xc97   :  { %1432 = vpow2.f32 %v1097_v26 }
 0xc98   :  { %1434 = vpow2.f32 %v1089_v30 }
 0xca1   :  { %v1433_v28 = vpop.eup %1432 }
 0xca2   :  { %1100 = vrot.lane.b32.xlu1 %v1433_v28, %s1467_s21  ;;  %v1435_v31 = vpop.eup %1434 }
 0xca6   :  { %1066 = vrot.lane.b32.xlu1 %v1713_v56, %s1467_s21  ;;  %s1471_s21 = smov 32  }
 0xd14   :  { %v1101_v32 = vpop.permute.xlu1 %1100 }
 0xd15   :  { %v1103_v33 = vadd.f32 %v1435_v31, %v1101_v32 }
 0xd17   :  { %1436 = vlog2.f32 %v1103_v33 }
 0xd18   :  { %1438 = vpow2.f32 %v1072_v41  ;;  %v1067_v43 = vpop.permute.xlu1 %1066 }
 0xd19   :  { %v1069_v45 = vsel %vm50_vm1, %v1067_v43, %v1713_v56 }
 0xd21   :  { %v1437_v34 = vpop.eup %1436 }
 0xd22   :  { %v1105_v35 = vmul.f32 0.6931472, %v1437_v34  ;;  %v1439_v48 = vpop.eup %1438 }
 0xd24   :  { %v1106_v36 = vadd.f32 %v1105_v35, %v1087_v24 }
 0xd26   :  { %1109 = vrot.lane.b32.xlu0 %v1106_v36, %s1468_s7  ;;  %v1107_v37 = vsub.f32 %v1058_v21, %v1106_v36 }
 0xd28   :  { %1114 = vrot.lane.b32.xlu1 %v1107_v37, %s1469_s8 }
 0xd2a   :  { %1080 = vrot.lane.b32.xlu0 %v1058_v21, %s1470_s15 }
 0xd2c   :  { %1061 = vrot.lane.b32.xlu1 %v1723_v62, %s1468_s7 }
 0xd98   :  { %v1110_v42 = vpop.permute.xlu0 %1109 }
 0xd99   :  { %v1112_v44 = vsub.f32 %v1058_v21, %v1110_v42 }
 0xd9a   :  { %v1115_v49 = vpop.permute.xlu1 %1114 }
 0xd9b   :  { %1118 = vrot.lane.b32.xlu0 %v1112_v44, %s1469_s8 }
 0xd9c   :  { %v1081_v46 = vpop.permute.xlu0 %1080 }
 0xd9d   :  { %v1083_v47 = vsub.f32 %v1069_v45, %v1081_v46 }
 0xd9e   :  { %v1062_v52 = vpop.permute.xlu1 %1061 }
 0xd9f   :  { %1123 = vrot.lane.b32.xlu1 %v1083_v47, %s1471_s21  ;;  %1075 = vrot.lane.b32.xlu0 %v1439_v48, %s1470_s15  ;;  %v1064_v53 = vsel %vm50_vm1, %v1723_v62, %v1062_v52 }
 0xda0   :  { %v1070_v55 = vsub.f32 %v1064_v53, %v1058_v21 }
 0xe0d   :  { %v1119_v50 = vpop.permute.xlu0 %1118 }
 0xe0e   :  { %v1121_v51 = vsel %vm50_vm1, %v1115_v49, %v1119_v50 }
 0xe0f   :  { %1127 = vrot.lane.b32.xlu0 %v1121_v51, %s1469_s8 }
 0xe11   :  { %v1076_v54 = vpop.permute.xlu0 %1075  ;;  %v1124_v56 = vpop.permute.xlu1 %1123 }
 0xe12   :  { %v1078_v57 = vmul.f32 %v1076_v54, %v1070_v55 }
 0xe14   :  { %v1130_v58 = vsel %vm129_vm2, %v1078_v57, %v1124_v56 }
 0xe81   :  { %v1128_v59 = vpop.permute.xlu0 %1127 }
 0xe82   :  { %v1132_v60 = vsel %vm1131_vm3, %v1130_v58, %v1128_v59 }
 0xe83   :  { %1134 = vst.msk [vmem:[#allocation2] sm:$0xff] %vm1133_vm4, %v1132_v60 }
 0xe84   :  { %1451 = shalt.err (!%p1448_p4)
}
 0xe85   :  { %s1452_s19 = scalar_lea.hbm %s1790_s9, 128 }
 0xe86   :  { %p1453_p5 = scmp.ne.s32.totalorder %s1790_s9, %s1452_s19  ;;  %p1456_p6 = scmp.lt.u32.totalorder %s1452_s19, %s1790_s9 }
 0xe88   :  { %p1458_p7 = pnand %p1456_p6, %p1453_p5 }
 0xe8a   :  { %1461 = shalt.err (!%p1458_p7)
}
 0xe8b   :  { %1144 = dma.vmem_to_hbm [thread:$0]  %s1142_s16, 128, %s1790_s9, [#allocation3]  }
 0xe8c   :  { %1462 = dma.done.wait [#allocation3], 128  }
 0xe8d   :  { %1463 = vsyncadd [#allocation3], 4294967168 }
 0xe8e   :  { %1148 = vsyncpa [#allocation3], 1 }

</bundles_post_ra>
